<compile_context>
chip_gen: v6e
topology: v6e:2x2x1
jax: 0.10.0
libtpu: 0.0.40
codegen_flags: <defaults>
</compile_context>

<pallas_src>
import functools

import jax
import jax.numpy as jnp
from jax.experimental import pallas as pl
from jax.experimental.pallas import tpu as pltpu

_NEG = -1e30  # mask value for padded softmax / log_softmax lanes


def _round_up(x, m):
    return ((x + m - 1) // m) * m


def _decoder_decode_kernel(ids_ref, emb_ref, w1_ref, wch_ref, wih_ref, wout_ref,
                           b1_ref, bih_ref, bout_ref, enc_ref, h0_ref,
                           out_ref, cat_ref, *, Dr, Lp, Vp):
    f32 = jnp.float32
    bf16 = jnp.bfloat16
    t = pl.program_id(0)

    # initialize the hidden carry on the first step
    @pl.when(t == 0)
    def _():
        cat_ref[:, Dr:] = h0_ref[...]

    # in-kernel embedding row gather (dropout = eval-mode identity)
    tok = ids_ref[t]
    cat_ref[:, :Dr] = emb_ref[pl.ds(tok, 1), :]

    x_cat = cat_ref[...]                         # (1, 2*Dr) f32 = [embedded | hidden]
    hid = x_cat[:, Dr:]                          # (1, Dr) carried hidden (f32)

    # fused first stage: attn logits | combine(emb) part | GRU hidden gates (r, z, n)
    fused = (jnp.dot(x_cat.astype(bf16), w1_ref[...], preferred_element_type=f32)
             + b1_ref[...])                      # (1, Lp + 4*Dr)

    # attn_weights = softmax(attn(cat(embedded, hidden)))  (padded lanes hold -1e30)
    a_logits = fused[:, :Lp]
    a_max = jnp.max(a_logits, axis=1, keepdims=True)
    a_exp = jnp.exp(a_logits - a_max)
    attn_w = a_exp / jnp.sum(a_exp, axis=1, keepdims=True)      # exact divide (scalar)

    # attn_applied = attn_weights @ encoder_outputs
    attn_applied = jnp.dot(attn_w.astype(bf16), enc_ref[...],
                           preferred_element_type=f32)          # (1, Dr)

    # output = relu(attn_combine(cat(embedded, attn_applied)))
    x = jnp.maximum(
        fused[:, Lp:Lp + Dr]
        + jnp.dot(attn_applied.astype(bf16), wch_ref[...], preferred_element_type=f32),
        0.0)                                                    # (1, Dr)

    # single-step GRU, PyTorch gate order r, z, n (b_hh already inside `fused`)
    gi = (jnp.dot(x.astype(bf16), wih_ref[...], preferred_element_type=f32)
          + bih_ref[...])                                       # (1, 3*Dr)
    gh_r = fused[:, Lp + Dr:Lp + 2 * Dr]
    gh_z = fused[:, Lp + 2 * Dr:Lp + 3 * Dr]
    gh_n = fused[:, Lp + 3 * Dr:Lp + 4 * Dr]
    r = jax.nn.sigmoid(gi[:, :Dr] + gh_r)
    z = jax.nn.sigmoid(gi[:, Dr:2 * Dr] + gh_z)
    n = jnp.tanh(gi[:, 2 * Dr:3 * Dr] + r * gh_n)
    h_new = (1.0 - z) * n + z * hid                             # (1, Dr)

    # output = log_softmax(out(gru_output))  (padded vocab lanes masked via -1e30 bias)
    logits = (jnp.dot(h_new.astype(bf16), wout_ref[...], preferred_element_type=f32)
              + bout_ref[...])                                  # (1, Vp)
    m = jnp.max(logits, axis=1, keepdims=True)
    lse = jnp.log(jnp.sum(jnp.exp(logits - m), axis=1, keepdims=True)) + m
    logp = logits - lse

    # carry hidden state to the next grid step, write packed per-step output
    cat_ref[:, Dr:] = h_new
    out_ref[:, :Vp] = logp
    out_ref[:, Vp:Vp + Lp] = attn_w
    out_ref[:, Vp + Lp:] = h_new


def pack_params(params):
    """One-time host-side fusion + padding of all decoder-step weights (bf16 weights,
    f32 biases; contraction dims padded to 16 sublanes, softmax lanes padded to 128)."""
    E = params["embedding"].shape[1]
    H = params["w_hh"].shape[-1]
    V = params["w_out"].shape[-1]
    L = params["b_attn"].shape[-1]
    Dr = _round_up(max(E, H), 16)    # contraction / hidden / embed (sublane) pad
    Lp = _round_up(L, 128)           # attention lane pad
    Vp = _round_up(V, 128)           # vocab lane pad
    f32, bf16 = jnp.float32, jnp.bfloat16

    def pad(a, rows, cols, fill=0.0):
        a = jnp.asarray(a, f32)
        out = jnp.full((rows, cols), fill, f32)
        return out.at[:a.shape[0], :a.shape[1]].set(a)

    zDD = jnp.zeros((Dr, Dr), f32)
    # block-stacked first-stage weight; lhs is [embedded | hidden] (1, 2*Dr)
    # columns: [attn (Lp) | combine_emb (Dr) | W_hh_r | W_hh_z | W_hh_n]
    top = jnp.concatenate([pad(params["w_attn_e"], Dr, Lp),
                           pad(params["w_comb_e"], Dr, Dr), zDD, zDD, zDD], axis=1)
    bot = jnp.concatenate([pad(params["w_attn_h"], Dr, Lp), zDD,
                           pad(params["w_hh"][0], Dr, Dr),
                           pad(params["w_hh"][1], Dr, Dr),
                           pad(params["w_hh"][2], Dr, Dr)], axis=1)
    w1 = jnp.concatenate([top, bot], axis=0).astype(bf16)            # (2*Dr, Lp+4*Dr)
    b1 = jnp.concatenate([pad(params["b_attn"], 1, Lp, _NEG),        # mask padded attn lanes
                          pad(params["b_comb"], 1, Dr),
                          pad(params["b_hh"][0], 1, Dr),
                          pad(params["b_hh"][1], 1, Dr),
                          pad(params["b_hh"][2], 1, Dr)], axis=1)    # (1, Lp+4*Dr) f32

    w_ch = pad(params["w_comb_h"], Dr, Dr).astype(bf16)              # (Dr, Dr)
    w_ih = jnp.concatenate([pad(params["w_ih"][g], Dr, Dr) for g in range(3)],
                           axis=1).astype(bf16)                      # (Dr, 3*Dr)
    b_ih = jnp.concatenate([pad(params["b_ih"][g], 1, Dr) for g in range(3)], axis=1)
    w_out = pad(params["w_out"], Dr, Vp).astype(bf16)                # (Dr, Vp)
    b_out = pad(params["b_out"], 1, Vp, _NEG)                        # mask padded vocab lanes

    # embedding table: bf16-rounded values, stored f32 for the in-kernel row gather
    emb_tbl = pad(params["embedding"].astype(bf16).astype(f32), V, Dr)

    return {"emb_tbl": emb_tbl, "w1": w1, "b1": b1, "w_ch": w_ch, "w_ih": w_ih,
            "b_ih": b_ih, "w_out": w_out, "b_out": b_out,
            "dims": dict(E=E, H=H, V=V, L=L, Dr=Dr, Lp=Lp, Vp=Vp)}


def _resident_spec(arr):
    # full-array block + constant index_map -> DMA'd once, VMEM-resident for all steps
    return pl.BlockSpec(arr.shape, lambda *_: (0,) * arr.ndim)


def decoder_rnn_decode(params, packed, token_ids, hidden, encoder_outputs, context,
                       context_outputs, use_context_attention=False):
    """Applies DecoderRNN.forward for every token in `token_ids` (teacher forcing),
    with the whole loop inside one pallas_call. Returns per-step
    (log_probs (T,V), hidden (T,H), attn_weights (T,L)); hidden[-1] is the final state."""
    d = packed["dims"]
    E, H, V, L = d["E"], d["H"], d["V"], d["L"]
    Dr, Lp, Vp = d["Dr"], d["Lp"], d["Vp"]

    # ---- hidden-init branches (one-time plain-JAX glue) ----
    if hidden is None:
        if use_context_attention:
            c0 = context[0]                                              # (1, C)
            caw = jax.nn.softmax(c0 @ params["w_cattn"] + params["b_cattn"], axis=1)
            capplied = caw @ context_outputs                             # (1, C)
            h = jnp.concatenate([c0, capplied], axis=1)                  # (1, 2C)
            h = jax.nn.relu(h @ params["w_ccomb"] + params["b_ccomb"])[None]
            hidden = h @ params["w_ht"] + params["b_ht"]                 # (1, 1, H)
        else:
            hidden = context @ params["w_ht"] + params["b_ht"]           # (1, 1, H)

    T = int(token_ids.shape[0])
    enc_p = jnp.zeros((Lp, Dr), jnp.bfloat16).at[:L, :H].set(
        encoder_outputs.astype(jnp.bfloat16))                            # per-sequence
    h0_p = jnp.zeros((1, Dr), jnp.float32).at[:, :H].set(hidden[0].astype(jnp.float32))

    out_cols = Vp + Lp + Dr
    operands = (packed["emb_tbl"], packed["w1"], packed["w_ch"], packed["w_ih"],
                packed["w_out"], packed["b1"], packed["b_ih"], packed["b_out"],
                enc_p, h0_p)

    flops_step = 2 * (2 * Dr * (Lp + 4 * Dr) + Lp * Dr + Dr * Dr + Dr * 3 * Dr + Dr * Vp)
    bytes_once = sum(int(a.size) * a.dtype.itemsize for a in operands) + 4 * T
    bytes_out = 4 * T * out_cols

    grid_spec = pltpu.PrefetchScalarGridSpec(
        num_scalar_prefetch=1,                       # token ids -> SMEM
        grid=(T,),
        in_specs=[_resident_spec(a) for a in operands],
        out_specs=pl.BlockSpec((None, 1, out_cols), lambda t, ids: (t, 0, 0)),
        scratch_shapes=[pltpu.VMEM((1, 2 * Dr), jnp.float32)],   # [embedded | hidden] carry
    )
    kernel = functools.partial(_decoder_decode_kernel, Dr=Dr, Lp=Lp, Vp=Vp)
    packed_out = pl.pallas_call(
        kernel,
        out_shape=jax.ShapeDtypeStruct((T, 1, out_cols), jnp.float32),
        grid_spec=grid_spec,
        compiler_params=pltpu.CompilerParams(dimension_semantics=("arbitrary",)),
        cost_estimate=pl.CostEstimate(flops=T * flops_step,
                                      transcendentals=T * (Lp + Vp + 3 * Dr + 2),
                                      bytes_accessed=bytes_once + bytes_out),
    )(token_ids.astype(jnp.int32), *operands)

    out = packed_out[:, 0]                           # (T, out_cols)
    log_probs = out[:, :V]                           # (T, V)
    attn_w = out[:, Vp:Vp + L]                       # (T, L)
    hiddens = out[:, Vp + Lp:Vp + Lp + H]            # (T, H)
    return log_probs, hiddens, attn_w


def init_params(key, output_size, hidden_size, context_hidden_size,
                embedding_size, max_length, max_context):
    V, H, C, E, L, MC = (output_size, hidden_size, context_hidden_size,
                         embedding_size, max_length, max_context)
    ks = list(jax.random.split(key, 10))

    def linear(k, fan_in, fan_out):
        k1, k2 = jax.random.split(k)
        bound = 1.0 / jnp.sqrt(jnp.float32(fan_in))
        w = jax.random.uniform(k1, (fan_in, fan_out), jnp.float32, -bound, bound)
        b = jax.random.uniform(k2, (1, fan_out), jnp.float32, -bound, bound)
        return w, b

    p = {}
    p["embedding"] = jax.random.normal(ks[0], (V, E), jnp.float32)

    w_attn, p["b_attn"] = linear(ks[1], E + H, L)        # attn: (E+H) -> L
    p["w_attn_e"], p["w_attn_h"] = w_attn[:E], w_attn[E:]

    w_comb, p["b_comb"] = linear(ks[2], E + H, E)        # attn_combine: (E+H) -> E
    p["w_comb_e"], p["w_comb_h"] = w_comb[:E], w_comb[E:]

    gru_bound = 1.0 / jnp.sqrt(jnp.float32(H))
    p["w_ih"] = jax.random.uniform(ks[3], (3, E, H), jnp.float32, -gru_bound, gru_bound)
    p["w_hh"] = jax.random.uniform(ks[4], (3, H, H), jnp.float32, -gru_bound, gru_bound)
    p["b_ih"] = jax.random.uniform(ks[5], (3, 1, H), jnp.float32, -gru_bound, gru_bound)
    p["b_hh"] = jax.random.uniform(ks[6], (3, 1, H), jnp.float32, -gru_bound, gru_bound)

    p["w_out"], p["b_out"] = linear(ks[7], H, V)          # out: H -> V
    p["w_ht"], p["b_ht"] = linear(ks[8], C, H)            # hidden_transform: C -> H
    k9a, k9b = jax.random.split(ks[9])
    p["w_cattn"], p["b_cattn"] = linear(k9a, C, MC)       # context_attn: C -> MC
    p["w_ccomb"], p["b_ccomb"] = linear(k9b, 2 * C, C)    # context_attn_combine: 2C -> C
    return p


def _bf16r(x):
    return jnp.asarray(x, jnp.bfloat16).astype(jnp.float32)


def _reference_decode(params, token_ids, hidden, encoder_outputs, context):
    """Pure-JAX teacher-forced reference (non-context-attention, eval-mode dropout).
    Uses bf16-rounded weights / embedding / encoder outputs (matching the kernel's
    weight storage) with f32 activations and biases."""
    if hidden is None:
        hidden = context @ params["w_ht"] + params["b_ht"]
    enc = _bf16r(encoder_outputs)
    emb_tbl = _bf16r(params["embedding"])
    w_ae, w_ah = _bf16r(params["w_attn_e"]), _bf16r(params["w_attn_h"])
    w_ce, w_ch = _bf16r(params["w_comb_e"]), _bf16r(params["w_comb_h"])
    w_ih, w_hh = _bf16r(params["w_ih"]), _bf16r(params["w_hh"])
    w_out = _bf16r(params["w_out"])

    lps, hs, aws = [], [], []
    for tok in list(token_ids):
        emb = emb_tbl[tok].reshape(1, -1)
        h0 = hidden[0]
        a_logits = emb @ w_ae + h0 @ w_ah + params["b_attn"]
        attn_w = jax.nn.softmax(a_logits, axis=1)
        attn_applied = attn_w @ enc
        x = jax.nn.relu(emb @ w_ce + attn_applied @ w_ch + params["b_comb"])
        i_r = x @ w_ih[0] + params["b_ih"][0]
        i_z = x @ w_ih[1] + params["b_ih"][1]
        i_n = x @ w_ih[2] + params["b_ih"][2]
        h_r = h0 @ w_hh[0] + params["b_hh"][0]
        h_z = h0 @ w_hh[1] + params["b_hh"][1]
        h_n = h0 @ w_hh[2] + params["b_hh"][2]
        r = jax.nn.sigmoid(i_r + h_r)
        z = jax.nn.sigmoid(i_z + h_z)
        n = jnp.tanh(i_n + r * h_n)
        h_new = (1.0 - z) * n + z * h0
        log_probs = jax.nn.log_softmax(h_new @ w_out + params["b_out"], axis=1)
        hidden = h_new[None]
        lps.append(log_probs); hs.append(h_new); aws.append(attn_w)
    return (jnp.concatenate(lps, 0), jnp.concatenate(hs, 0), jnp.concatenate(aws, 0))


if __name__ == "__main__":
    V, H, C, E, L, MC = 64, 32, 32, 32, 16, 8   # output/hidden/context/embed/max_len/max_ctx
    T = 6                                        # decode steps (teacher forcing)

    key = jax.random.PRNGKey(0)
    kp, k1, k2, k3, kt = jax.random.split(key, 5)
    params = init_params(kp, V, H, C, E, L, MC)
    packed = pack_params(params)                 # one-time host-side weight fusion/padding

    token_ids = jax.random.randint(kt, (T,), 0, V, dtype=jnp.int32)
    encoder_outputs = jax.random.normal(k1, (L, H), jnp.float32)     # (max_length, hidden)
    context = jax.random.normal(k2, (1, 1, C), jnp.float32)          # context vector
    context_outputs = jax.random.normal(k3, (MC, C), jnp.float32)    # (max_context, ctx_hidden)

    log_probs, hiddens, attn_w = decoder_rnn_decode(
        params, packed, token_ids, hidden=None,
        encoder_outputs=encoder_outputs, context=context,
        context_outputs=context_outputs, use_context_attention=False)
    jax.block_until_ready((log_probs, hiddens, attn_w))

    assert log_probs.shape == (T, V)
    assert hiddens.shape == (T, H)
    assert attn_w.shape == (T, L)
    # normalization invariants computed in f32 -> tight tolerances
    assert jnp.allclose(jnp.sum(jnp.exp(log_probs), axis=1), 1.0, atol=1e-4)
    assert jnp.allclose(jnp.sum(attn_w, axis=1), 1.0, atol=1e-4)

    # compare against a bf16-weight / f32-activation reference; remaining difference is
    # only activation bf16 rounding at the MXU inputs + accumulation order
    ref_lp, ref_h, ref_aw = _reference_decode(params, token_ids, None,
                                              encoder_outputs, context)
    assert jnp.allclose(attn_w, ref_aw, atol=3e-2, rtol=3e-2)
    assert jnp.allclose(hiddens, ref_h, atol=3e-2, rtol=3e-2)
    assert jnp.allclose(log_probs, ref_lp, atol=3e-2, rtol=3e-2)
    print("KERNEL_OK")
</pallas_src>

<mosaic_0001>
module attributes {stable_mosaic.version = 11 : i64} {
  func.func @_decoder_decode_kernel(%arg0: i32, %arg1: memref<6xi32, #tpu.memory_space<smem>>, %arg2: memref<64x32xf32, #tpu.memory_space<vmem>>, %arg3: memref<64x256xbf16, #tpu.memory_space<vmem>>, %arg4: memref<32x32xbf16, #tpu.memory_space<vmem>>, %arg5: memref<32x96xbf16, #tpu.memory_space<vmem>>, %arg6: memref<32x128xbf16, #tpu.memory_space<vmem>>, %arg7: memref<1x256xf32, #tpu.memory_space<vmem>>, %arg8: memref<1x96xf32, #tpu.memory_space<vmem>>, %arg9: memref<1x128xf32, #tpu.memory_space<vmem>>, %arg10: memref<128x32xbf16, #tpu.memory_space<vmem>>, %arg11: memref<1x32xf32, #tpu.memory_space<vmem>>, %arg12: memref<1x1x288xf32, #tpu.memory_space<vmem>>, %arg13: memref<1x64xf32, #tpu.memory_space<vmem>>) attributes {dimension_semantics = [#tpu.dimension_semantics<arbitrary>], iteration_bounds = array<i64: 6>, scalar_prefetch = 1 : i64, scratch_operands = 1 : i64, tpu.core_type = #tpu.core_type<tc>, window_params = [{pipeline_mode = #tpu.pipeline_mode<synchronous>, transform_indices = @transform_0, window_bounds = array<i64: 64, 32>}, {pipeline_mode = #tpu.pipeline_mode<synchronous>, transform_indices = @transform_1, window_bounds = array<i64: 64, 256>}, {pipeline_mode = #tpu.pipeline_mode<synchronous>, transform_indices = @transform_2, window_bounds = array<i64: 32, 32>}, {pipeline_mode = #tpu.pipeline_mode<synchronous>, transform_indices = @transform_3, window_bounds = array<i64: 32, 96>}, {pipeline_mode = #tpu.pipeline_mode<synchronous>, transform_indices = @transform_4, window_bounds = array<i64: 32, 128>}, {pipeline_mode = #tpu.pipeline_mode<synchronous>, transform_indices = @transform_5, window_bounds = array<i64: 1, 256>}, {pipeline_mode = #tpu.pipeline_mode<synchronous>, transform_indices = @transform_6, window_bounds = array<i64: 1, 96>}, {pipeline_mode = #tpu.pipeline_mode<synchronous>, transform_indices = @transform_7, window_bounds = array<i64: 1, 128>}, {pipeline_mode = #tpu.pipeline_mode<synchronous>, transform_indices = @transform_8, window_bounds = array<i64: 128, 32>}, {pipeline_mode = #tpu.pipeline_mode<synchronous>, transform_indices = @transform_9, window_bounds = array<i64: 1, 32>}, {transform_indices = @transform_10, window_bounds = array<i64: 1, 1, 288>}]} {
    %c0_i32 = arith.constant 0 : i32
    %0 = arith.cmpi eq, %arg0, %c0_i32 : i32
    %1 = arith.extui %0 : i1 to i32
    %c0_i32_0 = arith.constant 0 : i32
    %2 = arith.cmpi ne, %1, %c0_i32_0 : i32
    scf.if %2 {
      %c0_41 = arith.constant 0 : index
      %c0_42 = arith.constant 0 : index
      %92 = vector.load %arg11[%c0_41, %c0_42] : memref<1x32xf32, #tpu.memory_space<vmem>>, vector<1x32xf32>
      %c0_43 = arith.constant 0 : index
      %c32_44 = arith.constant 32 : index
      %93 = vector.load %arg13[%c0_43, %c32_44] : memref<1x64xf32, #tpu.memory_space<vmem>>, vector<1x32xf32>
      tpu.vector_store %arg13[%c0_43, %c32_44], %92 {strides = array<i32>} : memref<1x64xf32, #tpu.memory_space<vmem>>, vector<1x32xf32>,
    } else {
    }
    %3 = arith.index_cast %arg0 : i32 to index
    %4 = memref.load %arg1[%3] : memref<6xi32, #tpu.memory_space<smem>>
    %5 = arith.index_cast %4 : i32 to index
    %c0 = arith.constant 0 : index
    %6 = vector.load %arg2[%5, %c0] : memref<64x32xf32, #tpu.memory_space<vmem>>, vector<1x32xf32>
    %c0_1 = arith.constant 0 : index
    %c0_2 = arith.constant 0 : index
    %7 = vector.load %arg13[%c0_1, %c0_2] : memref<1x64xf32, #tpu.memory_space<vmem>>, vector<1x32xf32>
    tpu.vector_store %arg13[%c0_1, %c0_2], %6 {strides = array<i32>} : memref<1x64xf32, #tpu.memory_space<vmem>>, vector<1x32xf32>,
    %c0_3 = arith.constant 0 : index
    %c0_4 = arith.constant 0 : index
    %8 = vector.load %arg13[%c0_3, %c0_4] : memref<1x64xf32, #tpu.memory_space<vmem>>, vector<1x64xf32>
    %9 = vector.extract_strided_slice %8 {offsets = [0, 32], sizes = [1, 32], strides = [1, 1]} : vector<1x64xf32> to vector<1x32xf32>
    %10 = arith.truncf %8 : vector<1x64xf32> to vector<1x64xbf16>
    %c0_5 = arith.constant 0 : index
    %c0_6 = arith.constant 0 : index
    %11 = vector.load %arg3[%c0_5, %c0_6] : memref<64x256xbf16, #tpu.memory_space<vmem>>, vector<64x256xbf16>
    %cst = arith.constant dense<0.000000e+00> : vector<1x256xf32>
    %12 = tpu.matmul %10, %11, %cst {dimension_numbers = #tpu.dot_dimension_numbers<[1], [0], [0], [1], [0, 0, 1, 1], [], []>} : vector<1x64xbf16>, vector<64x256xbf16>, vector<1x256xf32> -> vector<1x256xf32>
    %c0_7 = arith.constant 0 : index
    %c0_8 = arith.constant 0 : index
    %13 = vector.load %arg7[%c0_7, %c0_8] : memref<1x256xf32, #tpu.memory_space<vmem>>, vector<1x256xf32>
    %14 = arith.addf %12, %13 : vector<1x256xf32>
    %15 = vector.extract_strided_slice %14 {offsets = [0, 0], sizes = [1, 128], strides = [1, 1]} : vector<1x256xf32> to vector<1x128xf32>
    %cst_9 = arith.constant dense<0xFF800000> : vector<1xf32>
    %16 = vector.multi_reduction <maximumf>, %15, %cst_9 [1] : vector<1x128xf32> to vector<1xf32>
    %17 = vector.shape_cast %16 : vector<1xf32> to vector<1x1xf32>
    %18 = vector.broadcast %17 : vector<1x1xf32> to vector<1x128xf32>
    %19 = arith.subf %15, %18 : vector<1x128xf32>
    %20 = math.exp %19 : vector<1x128xf32>
    %cst_10 = arith.constant dense<0.000000e+00> : vector<1xf32>
    %21 = vector.multi_reduction <add>, %20, %cst_10 [1] : vector<1x128xf32> to vector<1xf32>
    %22 = vector.shape_cast %21 : vector<1xf32> to vector<1x1xf32>
    %23 = vector.broadcast %22 : vector<1x1xf32> to vector<1x128xf32>
    %24 = arith.divf %20, %23 : vector<1x128xf32>
    %25 = arith.truncf %24 : vector<1x128xf32> to vector<1x128xbf16>
    %c0_11 = arith.constant 0 : index
    %c0_12 = arith.constant 0 : index
    %26 = vector.load %arg10[%c0_11, %c0_12] : memref<128x32xbf16, #tpu.memory_space<vmem>>, vector<128x32xbf16>
    %cst_13 = arith.constant dense<0.000000e+00> : vector<1x32xf32>
    %27 = tpu.matmul %25, %26, %cst_13 {dimension_numbers = #tpu.dot_dimension_numbers<[1], [0], [0], [1], [0, 0, 1, 1], [], []>} : vector<1x128xbf16>, vector<128x32xbf16>, vector<1x32xf32> -> vector<1x32xf32>
    %28 = vector.extract_strided_slice %14 {offsets = [0, 128], sizes = [1, 32], strides = [1, 1]} : vector<1x256xf32> to vector<1x32xf32>
    %29 = arith.truncf %27 : vector<1x32xf32> to vector<1x32xbf16>
    %c0_14 = arith.constant 0 : index
    %c0_15 = arith.constant 0 : index
    %30 = vector.load %arg4[%c0_14, %c0_15] : memref<32x32xbf16, #tpu.memory_space<vmem>>, vector<32x32xbf16>
    %cst_16 = arith.constant dense<0.000000e+00> : vector<1x32xf32>
    %31 = tpu.matmul %29, %30, %cst_16 {dimension_numbers = #tpu.dot_dimension_numbers<[1], [0], [0], [1], [0, 0, 1, 1], [], []>} : vector<1x32xbf16>, vector<32x32xbf16>, vector<1x32xf32> -> vector<1x32xf32>
    %32 = arith.addf %28, %31 : vector<1x32xf32>
    %cst_17 = arith.constant 0.000000e+00 : f32
    %33 = vector.broadcast %cst_17 : f32 to vector<1x32xf32>
    %34 = arith.maximumf %32, %33 : vector<1x32xf32>
    %35 = arith.truncf %34 : vector<1x32xf32> to vector<1x32xbf16>
    %c0_18 = arith.constant 0 : index
    %c0_19 = arith.constant 0 : index
    %36 = vector.load %arg5[%c0_18, %c0_19] : memref<32x96xbf16, #tpu.memory_space<vmem>>, vector<32x96xbf16>
    %cst_20 = arith.constant dense<0.000000e+00> : vector<1x96xf32>
    %37 = tpu.matmul %35, %36, %cst_20 {dimension_numbers = #tpu.dot_dimension_numbers<[1], [0], [0], [1], [0, 0, 1, 1], [], []>} : vector<1x32xbf16>, vector<32x96xbf16>, vector<1x96xf32> -> vector<1x96xf32>
    %c0_21 = arith.constant 0 : index
    %c0_22 = arith.constant 0 : index
    %38 = vector.load %arg8[%c0_21, %c0_22] : memref<1x96xf32, #tpu.memory_space<vmem>>, vector<1x96xf32>
    %39 = arith.addf %37, %38 : vector<1x96xf32>
    %40 = vector.extract_strided_slice %14 {offsets = [0, 160], sizes = [1, 32], strides = [1, 1]} : vector<1x256xf32> to vector<1x32xf32>
    %41 = vector.extract_strided_slice %14 {offsets = [0, 192], sizes = [1, 32], strides = [1, 1]} : vector<1x256xf32> to vector<1x32xf32>
    %42 = vector.extract_strided_slice %14 {offsets = [0, 224], sizes = [1, 32], strides = [1, 1]} : vector<1x256xf32> to vector<1x32xf32>
    %43 = vector.extract_strided_slice %39 {offsets = [0, 0], sizes = [1, 32], strides = [1, 1]} : vector<1x96xf32> to vector<1x32xf32>
    %44 = arith.addf %43, %40 : vector<1x32xf32>
    %45 = arith.negf %44 : vector<1x32xf32>
    %46 = math.exp %45 : vector<1x32xf32>
    %cst_23 = arith.constant 1.000000e+00 : f32
    %47 = vector.broadcast %cst_23 : f32 to vector<1x32xf32>
    %48 = arith.addf %47, %46 : vector<1x32xf32>
    %49 = arith.divf %47, %48 : vector<1x32xf32>
    %50 = vector.extract_strided_slice %39 {offsets = [0, 32], sizes = [1, 32], strides = [1, 1]} : vector<1x96xf32> to vector<1x32xf32>
    %51 = arith.addf %50, %41 : vector<1x32xf32>
    %52 = arith.negf %51 : vector<1x32xf32>
    %53 = math.exp %52 : vector<1x32xf32>
    %cst_24 = arith.constant 1.000000e+00 : f32
    %54 = vector.broadcast %cst_24 : f32 to vector<1x32xf32>
    %55 = arith.addf %54, %53 : vector<1x32xf32>
    %56 = arith.divf %54, %55 : vector<1x32xf32>
    %57 = vector.extract_strided_slice %39 {offsets = [0, 64], sizes = [1, 32], strides = [1, 1]} : vector<1x96xf32> to vector<1x32xf32>
    %58 = arith.mulf %49, %42 : vector<1x32xf32>
    %59 = arith.addf %57, %58 : vector<1x32xf32>
    %60 = math.tanh %59 : vector<1x32xf32>
    %cst_25 = arith.constant 1.000000e+00 : f32
    %61 = vector.broadcast %cst_25 : f32 to vector<1x32xf32>
    %62 = arith.subf %61, %56 : vector<1x32xf32>
    %63 = arith.mulf %62, %60 : vector<1x32xf32>
    %64 = arith.mulf %56, %9 : vector<1x32xf32>
    %65 = arith.addf %63, %64 : vector<1x32xf32>
    %66 = arith.truncf %65 : vector<1x32xf32> to vector<1x32xbf16>
    %c0_26 = arith.constant 0 : index
    %c0_27 = arith.constant 0 : index
    %67 = vector.load %arg6[%c0_26, %c0_27] : memref<32x128xbf16, #tpu.memory_space<vmem>>, vector<32x128xbf16>
    %cst_28 = arith.constant dense<0.000000e+00> : vector<1x128xf32>
    %68 = tpu.matmul %66, %67, %cst_28 {dimension_numbers = #tpu.dot_dimension_numbers<[1], [0], [0], [1], [0, 0, 1, 1], [], []>} : vector<1x32xbf16>, vector<32x128xbf16>, vector<1x128xf32> -> vector<1x128xf32>
    %c0_29 = arith.constant 0 : index
    %c0_30 = arith.constant 0 : index
    %69 = vector.load %arg9[%c0_29, %c0_30] : memref<1x128xf32, #tpu.memory_space<vmem>>, vector<1x128xf32>
    %70 = arith.addf %68, %69 : vector<1x128xf32>
    %cst_31 = arith.constant dense<0xFF800000> : vector<1xf32>
    %71 = vector.multi_reduction <maximumf>, %70, %cst_31 [1] : vector<1x128xf32> to vector<1xf32>
    %72 = vector.shape_cast %71 : vector<1xf32> to vector<1x1xf32>
    %73 = vector.broadcast %72 : vector<1x1xf32> to vector<1x128xf32>
    %74 = arith.subf %70, %73 : vector<1x128xf32>
    %75 = math.exp %74 : vector<1x128xf32>
    %cst_32 = arith.constant dense<0.000000e+00> : vector<1xf32>
    %76 = vector.multi_reduction <add>, %75, %cst_32 [1] : vector<1x128xf32> to vector<1xf32>
    %77 = vector.shape_cast %76 : vector<1xf32> to vector<1x1xf32>
    %78 = math.log %77 : vector<1x1xf32>
    %79 = arith.addf %78, %72 : vector<1x1xf32>
    %80 = vector.broadcast %79 : vector<1x1xf32> to vector<1x128xf32>
    %81 = arith.subf %70, %80 : vector<1x128xf32>
    %c0_33 = arith.constant 0 : index
    %c32 = arith.constant 32 : index
    %82 = vector.load %arg13[%c0_33, %c32] : memref<1x64xf32, #tpu.memory_space<vmem>>, vector<1x32xf32>
    tpu.vector_store %arg13[%c0_33, %c32], %65 {strides = array<i32>} : memref<1x64xf32, #tpu.memory_space<vmem>>, vector<1x32xf32>,
    %c0_34 = arith.constant 0 : index
    %c0_35 = arith.constant 0 : index
    %c0_36 = arith.constant 0 : index
    %83 = vector.load %arg12[%c0_34, %c0_35, %c0_36] : memref<1x1x288xf32, #tpu.memory_space<vmem>>, vector<1x1x128xf32>
    %84 = vector.shape_cast %83 : vector<1x1x128xf32> to vector<1x128xf32>
    %85 = vector.shape_cast %81 : vector<1x128xf32> to vector<1x1x128xf32>
    tpu.vector_store %arg12[%c0_34, %c0_35, %c0_36], %85 {strides = array<i32>} : memref<1x1x288xf32, #tpu.memory_space<vmem>>, vector<1x1x128xf32>,
    %c0_37 = arith.constant 0 : index
    %c0_38 = arith.constant 0 : index
    %c128 = arith.constant 128 : index
    %86 = vector.load %arg12[%c0_37, %c0_38, %c128] : memref<1x1x288xf32, #tpu.memory_space<vmem>>, vector<1x1x128xf32>
    %87 = vector.shape_cast %86 : vector<1x1x128xf32> to vector<1x128xf32>
    %88 = vector.shape_cast %24 : vector<1x128xf32> to vector<1x1x128xf32>
    tpu.vector_store %arg12[%c0_37, %c0_38, %c128], %88 {strides = array<i32>} : memref<1x1x288xf32, #tpu.memory_space<vmem>>, vector<1x1x128xf32>,
    %c0_39 = arith.constant 0 : index
    %c0_40 = arith.constant 0 : index
    %c256 = arith.constant 256 : index
    %89 = vector.load %arg12[%c0_39, %c0_40, %c256] : memref<1x1x288xf32, #tpu.memory_space<vmem>>, vector<1x1x32xf32>
    %90 = vector.shape_cast %89 : vector<1x1x32xf32> to vector<1x32xf32>
    %91 = vector.shape_cast %65 : vector<1x32xf32> to vector<1x1x32xf32>
    tpu.vector_store %arg12[%c0_39, %c0_40, %c256], %91 {strides = array<i32>} : memref<1x1x288xf32, #tpu.memory_space<vmem>>, vector<1x1x32xf32>,
    return
  }
  func.func @transform_0(%arg0: i32, %arg1: memref<6xi32, #tpu.memory_space<smem>>) -> (i32, i32) {
    %c0_i32 = arith.constant 0 : i32
    %c0_i32_0 = arith.constant 0 : i32
    %c0_i32_1 = arith.constant 0 : i32
    return %c0_i32, %c0_i32_0 : i32, i32
  }
  func.func @transform_1(%arg0: i32, %arg1: memref<6xi32, #tpu.memory_space<smem>>) -> (i32, i32) {
    %c0_i32 = arith.constant 0 : i32
    %c0_i32_0 = arith.constant 0 : i32
    %c0_i32_1 = arith.constant 0 : i32
    return %c0_i32, %c0_i32_0 : i32, i32
  }
  func.func @transform_2(%arg0: i32, %arg1: memref<6xi32, #tpu.memory_space<smem>>) -> (i32, i32) {
    %c0_i32 = arith.constant 0 : i32
    %c0_i32_0 = arith.constant 0 : i32
    %c0_i32_1 = arith.constant 0 : i32
    return %c0_i32, %c0_i32_0 : i32, i32
  }
  func.func @transform_3(%arg0: i32, %arg1: memref<6xi32, #tpu.memory_space<smem>>) -> (i32, i32) {
    %c0_i32 = arith.constant 0 : i32
    %c0_i32_0 = arith.constant 0 : i32
    %c0_i32_1 = arith.constant 0 : i32
    return %c0_i32, %c0_i32_0 : i32, i32
  }
  func.func @transform_4(%arg0: i32, %arg1: memref<6xi32, #tpu.memory_space<smem>>) -> (i32, i32) {
    %c0_i32 = arith.constant 0 : i32
    %c0_i32_0 = arith.constant 0 : i32
    %c0_i32_1 = arith.constant 0 : i32
    return %c0_i32, %c0_i32_0 : i32, i32
  }
  func.func @transform_5(%arg0: i32, %arg1: memref<6xi32, #tpu.memory_space<smem>>) -> (i32, i32) {
    %c0_i32 = arith.constant 0 : i32
    %c0_i32_0 = arith.constant 0 : i32
    %c0_i32_1 = arith.constant 0 : i32
    return %c0_i32, %c0_i32_0 : i32, i32
  }
  func.func @transform_6(%arg0: i32, %arg1: memref<6xi32, #tpu.memory_space<smem>>) -> (i32, i32) {
    %c0_i32 = arith.constant 0 : i32
    %c0_i32_0 = arith.constant 0 : i32
    %c0_i32_1 = arith.constant 0 : i32
    return %c0_i32, %c0_i32_0 : i32, i32
  }
  func.func @transform_7(%arg0: i32, %arg1: memref<6xi32, #tpu.memory_space<smem>>) -> (i32, i32) {
    %c0_i32 = arith.constant 0 : i32
    %c0_i32_0 = arith.constant 0 : i32
    %c0_i32_1 = arith.constant 0 : i32
    return %c0_i32, %c0_i32_0 : i32, i32
  }
  func.func @transform_8(%arg0: i32, %arg1: memref<6xi32, #tpu.memory_space<smem>>) -> (i32, i32) {
    %c0_i32 = arith.constant 0 : i32
    %c0_i32_0 = arith.constant 0 : i32
    %c0_i32_1 = arith.constant 0 : i32
    return %c0_i32, %c0_i32_0 : i32, i32
  }
  func.func @transform_9(%arg0: i32, %arg1: memref<6xi32, #tpu.memory_space<smem>>) -> (i32, i32) {
    %c0_i32 = arith.constant 0 : i32
    %c0_i32_0 = arith.constant 0 : i32
    %c0_i32_1 = arith.constant 0 : i32
    return %c0_i32, %c0_i32_0 : i32, i32
  }
  func.func @transform_10(%arg0: i32, %arg1: memref<6xi32, #tpu.memory_space<smem>>) -> (i32, i32, i32) {
    %c0_i32 = arith.constant 0 : i32
    %c0_i32_0 = arith.constant 0 : i32
    %c0_i32_1 = arith.constant 0 : i32
    return %arg0, %c0_i32, %c0_i32_0 : i32, i32, i32
  }
}

</mosaic_0001>

<bundles_post_ra>
// kernel: tpu_custom_call.1
= control target key start
LH: loop header
LB: loop body
LE: loop exit
PB: predicated region body
PF: predicated region fallthrough
CT: control target
= control target key end

     0   :  { %s1482_s0 = inlined_call_operand.vmem [shape: s32[6], index: 0, kind: input, shape index: {}]   ;;  %s1483_s1 = inlined_call_operand.vmem [shape: f32[64,32], index: 1, kind: input, shape index: {}]   ;;  %s1484_s2 = inlined_call_operand.vmem [shape: bf16[64,256], index: 2, kind: input, shape index: {}]   ;;  %s1485_s3 = inlined_call_operand.vmem [shape: bf16[32,32], index: 3, kind: input, shape index: {}]   ;;  %s1486_s4 = inlined_call_operand.vmem [shape: bf16[32,96], index: 4, kind: input, shape index: {}]   ;;  %s1487_s5 = inlined_call_operand.vmem [shape: bf16[32,128], index: 5, kind: input, shape index: {}]   ;;  %s1488_s6 = inlined_call_operand.vmem [shape: f32[1,256], index: 6, kind: input, shape index: {}]   ;;  %s1489_s7 = inlined_call_operand.vmem [shape: f32[1,96], index: 7, kind: input, shape index: {}]   ;;  %s1490_s8 = inlined_call_operand.vmem [shape: f32[1,128], index: 8, kind: input, shape index: {}]   ;;  %s1491_s9 = inlined_call_operand.vmem [shape: bf16[128,32], index: 9, kind: input, shape index: {}]   ;;  %s1492_s10 = inlined_call_operand.vmem [shape: f32[1,32], index: 10, kind: input, shape index: {}]   ;;  %s1493_s11 = inlined_call_operand.hbm [shape: f32[6,1,288], index: 11, kind: output, shape index: {}]  }
   0x1   :  { %1495 = sst [smem:[#allocation10_spill]] %s1492_s10  ;;  %s16_s19 = sshll.u32 %s1482_s0, 4  ;;  %s17_s19 = int_to_ptr.vmem [resolvable:$true] %s16_s19 }
   0x2   :  { %s1099_s20 = scalar_lea.vmem %s17_s19, 16  ;;  %p1104_p1 = scmp.lt.s32.totalorder %s17_s19, %s17_s19 }
   0x3   :  { %p1100_p0 = scmp.ne.s32.totalorder %s17_s19, %s1099_s20  ;;  %p1105_p2 = scmp.lt.s32.totalorder %s1099_s20, %s1099_s20 }
   0x5   :  { %p1106_p3 = por %p1105_p2, %p1104_p1 }
   0x7   :  { %p1107_p4 = pnand %p1106_p3, %p1100_p0 }
   0x9   :  { %1110 = shalt.err (!%p1107_p4)  }
   0xa   :  { %s1175_s21 = smov [#allocation4]  }
   0xb   :  { %19 = dma.vmem_to_smem %s17_s19, 16, %s1175_s21, [#allocation3] }
   0xc   :  { %1153 = dma.done.wait [#allocation3], 16 }
   0xd   :  { %1154 = vsyncadd [#allocation3], 4294967280 }
   0xe   :  { %21 = sfence }
   0xf   :  { %22 = vsyncpa [#allocation6], 0 }
  0x10   :  { %24 = vsyncpa [#allocation6 + $0x1], 0  ;;  %s1248_s22 = smov 0   ;;  %s1250_s23 = smov 0  }
  0x11   :  { %s1252_s0 = smov 0   ;;  %s1254_s24 = smov 0  }
  0x12 LB: > { %s1269_s25 = sadd.s32 4294967295, %s1173_s24   ;;  %s912_s26 = sadd.s32 4294967294, %s1173_s24   ;;  %s1173_s24 = sphi %s1254_s24, %s1507_s24   ;;  %s1169_s0 = sphi %s1252_s0, %s1506_s0   ;;  %s1165_s23 = sphi %s1250_s23, %s1505_s23   ;;  %s1161_s22 = sphi %s1248_s22, %s1504_s22  }
  0x13   : > { %s1273_s27 = sadd.s32 1, %s1173_s24   ;;  %s247_s28 = sadd.s32 1, %s1169_s0 }
  0x14   : > { %s244_s29 = ssub.s32 %s1173_s24, %s1273_s27  ;;  %p257_p5 = scmp.ne.s32.totalorder %s1169_s0, %s1165_s23 }
  0x15   : > { %p245_p6 = scmp.eq.s32.totalorder %s244_s29, 0  ;;  %p258_p7 = scmp.eq.s32.totalorder %s1269_s25, 5 }
  0x16   : > { %p263_p8 = scmp.ne.s32.totalorder %s1165_s23, %s1161_s22  ;;  %p264_p9 = scmp.eq.s32.totalorder %s912_s26, 5 }
  0x17   : > { %s1284_s30 = scalar_select %p245_p6, %s1169_s0, %s247_s28  }
  0x18   : > { %p1286_p10 = por %p258_p7, %p257_p5  ;;  %p1290_p11 = por %p264_p9, %p263_p8 }
  0x19   : > { %1496 = sst [smem:[#allocation9_spill]] %s1284_s30  ;;  %p914_p12 = scmp.ge.s32.totalorder %s1173_s24, 1 }
  0x1a   : > { %p312_p13 = scmp.lt.s32.totalorder %s1173_s24, 7 }
  0x1c   : > { %p313_p0 = pnand %p914_p12, %p312_p13 }
  0x1d   : > { %s1494_s14 = sand.u32 (!%p313_p0), 1, %s1165_s23   ;;  %p915_p1 = scmp.ne.s32.totalorder (!%p313_p0), %s1269_s25, 0 }
  0x1e   : > { %316 = sbr.rel (%p313_p0) target bundleno = 2201 (0x899), region = 60 }
  0x1f   : > { %s1009_s15 = smul.u32 (!%p313_p0), 3, %s1494_s14 }
  0x21   : > { %s1299_s16 = scalar_lea.vmem (!%p313_p0), [#allocation5], %s1009_s15 }
  0x23   : > { %349 = sbr.rel (%p915_p1) target bundleno = 158 (0x9e), region = 64  ;;  %s1499_s10 = sld [smem:[#allocation10_spill]] (!%p915_p1) }
  0x24   : > { %s1176_s19 = smov (!%p915_p1), 32  }
  0x28   : > { %vm359_vm0 = vcmask 516352  }
  0x29   : > { %v916_v0 = vld [vmem:[%s1499_s10] ss:$0 sm:$0xff] }
  0x2a   : > { %356 = vrot.lane.b32.xlu0 %v916_v0, %s1176_s19 }
  0x9c   : > { %v357_v1 = vpop.permute.xlu0 %356 }
  0x9d   : > { %360 = vst.msk [vmem:[#allocation2] sm:$0x1] %vm359_vm0, %v357_v1 }
  0x9e PF: > { %v1059_v2 = vld [vmem:[%s1484_s2 + $0x34] ss:$8 sps:$4 sm:$0xff]   ;;  %s361_s26 = sld [smem:[#allocation4 + %s1269_s25]]  ;;  %v1061_v3 = vld [vmem:[%s1484_s2 + $0x30] ss:$8 sps:$4 sm:$0xff]   ;;  %v1177_v4 = vmov 0   ;;  %v418_v14 = vlaneseq }
  0x9f   : > { %464 = vmatprep.mubr.bf16.mxu0 %v1177_v4  ;;  %440 = vmatprep.subr.bf16.mxu0 %v1059_v2  ;;  %v1062_v5 = vld [vmem:[%s1484_s2 + $0x24] ss:$8 sps:$4 sm:$0xff]   ;;  %v1064_v6 = vld [vmem:[%s1484_s2 + $0x20] ss:$8 sps:$4 sm:$0xff]   ;;  %v1065_v7 = vld [vmem:[%s1484_s2 + $0x14] ss:$8 sps:$4 sm:$0xff]  }
  0xa0   : > { %441 = vmatpush1.bf16.msra.mxu0 %v1061_v3  ;;  %v1067_v8 = vld [vmem:[%s1484_s2 + $0x10] ss:$8 sps:$4 sm:$0xff]   ;;  %vm364_vm1 = vcmask 253952   ;;  %v1068_v9 = vld [vmem:[%s1484_s2 + $0x4] ss:$8 sps:$4 sm:$0xff]   ;;  %vm428_vm2 = vcmask 523264  }
  0xa1   : > { %442 = vmatprep.subr.bf16.mxu0 %v1062_v5  ;;  %v1070_v11 = vld [vmem:[%s1484_s2] ss:$8 sps:$4 sm:$0xff]   ;;  %v1338_v15 = vshrl.u32 %v418_v14, 7  ;;  %vm473_vm3 = vcmask 1040384   ;;  %s1178_s14 = smov 96   ;;  %v1071_v28 = vld [vmem:[%s1491_s9 + $0x38] sm:$0xff]  }
  0xa2   : > { %v376_v17 = vld [vmem:[%s1488_s6] sm:$0x3]  ;;  %v1180_v29 = vmov 0.0   ;;  %v1072_v30 = vld [vmem:[%s1491_s9 + $0x30] sm:$0xff]   ;;  %v1073_v31 = vld [vmem:[%s1491_s9 + $0x28] sm:$0xff]   ;;  %vm1181_vm4 = vmmov 0  }
  0xa3   : > { %v420_v16 = vsub.s32 0, %v1338_v15  ;;  %v424_v18 = vsub.s32 1, %v1338_v15  ;;  %965 = vmatprep.subr.bf16.mxu1 %v1180_v29  ;;  %v1074_v32 = vld [vmem:[%s1491_s9 + $0x20] sm:$0xff]   ;;  %v1075_v38 = vld [vmem:[%s1491_s9 + $0x18] sm:$0xff]   ;;  %981 = vmatprep.mubr.msk.bf16.mxu1 %vm1181_vm4, %v1180_v29  ;;  %v1076_v39 = vld [vmem:[%s1491_s9 + $0x10] sm:$0xff]   ;;  %vm1398_vm5 = vcmp.lt.s32.totalorder %v418_v14, 128 }
  0xa4   : > { %s362_s30 = scalar_lea.vmem %s1483_s1, %s361_s26  ;;  %443 = vmatpush1.bf16.msra.mxu0 %v1064_v6  ;;  %s1179_s26 = smov 32   ;;  %966 = vmatpush3.bf16.msra.mxu1 %v1071_v28  ;;  %v1077_v40 = vld [vmem:[%s1491_s9 + $0x8] sm:$0xff]   ;;  %v1078_v41 = vld [vmem:[%s1491_s9] sm:$0xff]   ;;  %vm607_vm6 = vcmask 261120   ;;  %vm820_vm7 = vcmask 516352   ;;  %vm846_vm8 = vcmp.lt.s32.totalorder %v418_v14, 32 }
  0xa5   : > { %v363_v10 = vld [vmem:[%s362_s30] sm:$0x1]  ;;  %444 = vmatprep.subr.bf16.mxu0 %v1065_v7  ;;  %v421_v19 = vrot.slane %v376_v17, %v420_v16  ;;  %v425_v20 = vrot.slane %v376_v17, %v424_v18  ;;  %967 = vmatprep.subr.bf16.mxu1 %v1180_v29  ;;  %v1079_v42 = vld [vmem:[%s1485_s3 + $0x8] sm:$0xff]   ;;  %s1182_s15 = smov 64   ;;  %s864_s20 = sshll.u32 %s1299_s16, 4  ;;  %s865_s20 = int_to_ptr.vmem [resolvable:$true] %s864_s20 }
  0xa6   : > { %365 = vst.msk [vmem:[#allocation2] sm:$0x1] %vm364_vm1, %v363_v10  ;;  %v1080_v43 = vld [vmem:[%s1485_s3] sm:$0xff]   ;;  %v1081_v50 = vld [vmem:[%s1486_s4 + $0x8] sm:$0xff]   ;;  %s1111_s18 = scalar_lea.vmem %s865_s20, 48  ;;  %s1184_s19 = smov [#allocation5]  }
  0xa7   : > { %v1082_v55 = vld [vmem:[%s1486_s4] sm:$0xff]   ;;  %v1083_v18 = vld [vmem:[%s1487_s5 + $0x8] sm:$0xff]   ;;  %p1112_p2 = scmp.ne.s32.totalorder %s865_s20, %s1111_s18 }
  0xa8   : > { %445 = vmatpush1.bf16.msra.mxu0 %v1067_v8  ;;  %968 = vmatpush3.bf16.msra.mxu1 %v1072_v30  ;;  %v658_v63 = vld [vmem:[%s1489_s7] sm:$0x1] }
  0xa9   : > { %446 = vmatprep.subr.bf16.mxu0 %v1068_v9  ;;  %969 = vmatprep.subr.bf16.mxu1 %v1180_v29  ;;  %v748_v28 = vld [vmem:[%s1490_s8] sm:$0x1]  ;;  %p1113_p3 = pnand %p1112_p2, %p1286_p10 }
  0xab   : > { %p1114_p4 = pneg %p1113_p3 }
  0xac   : > { %447 = vmatpush1.bf16.msra.mxu0 %v1070_v11  ;;  %970 = vmatpush3.bf16.msra.mxu1 %v1073_v31 }
  0xad   : > { %v1333_v12 = vld [vmem:[#allocation2] sm:$0x1]  ;;  %985 = vmatprep.subr.bf16.mxu0 %v1180_v29  ;;  %971 = vmatprep.subr.bf16.mxu1 %v1180_v29 }
  0xae   : > { %v367_v13 = vpack.c.bf16 %v1333_v12, %v1333_v12 }
  0xb0   : > { %925 = vmatmul.mubr.msk.bf16.vlgmr.msra.gmra.mxu0 %vm428_vm2, %v367_v13  ;;  %972 = vmatpush3.bf16.msra.mxu1 %v1074_v32 }
  0xb1   : > { %973 = vmatprep.subr.bf16.mxu1 %v1180_v29  ;;  %989 = vmatprep.mubr.msk.bf16.mxu0 %vm1181_vm4, %v1180_v29 }
  0xb2   : > { %986 = vmatpush3.bf16.msra.mxu0 %v1079_v42 }
  0xb3   : > { %987 = vmatprep.subr.bf16.mxu0 %v1180_v29 }
  0xb4   : > { %974 = vmatpush3.bf16.msra.mxu1 %v1075_v38 }
  0xb5   : > { %975 = vmatprep.subr.bf16.mxu1 %v1180_v29 }
  0xb6   : > { %988 = vmatpush3.bf16.msra.mxu0 %v1080_v43 }
  0xb7   : > { %993 = vmatprep.subr.bf16.mxu0 %v1180_v29 }
  0xb8   : > { %976 = vmatpush3.bf16.msra.mxu1 %v1076_v39 }
  0xb9   : > { %977 = vmatprep.subr.bf16.mxu1 %v1180_v29 }
  0xbc   : > { %978 = vmatpush3.bf16.msra.mxu1 %v1077_v40 }
  0xbd   : > { %979 = vmatprep.subr.bf16.mxu1 %v1180_v29 }
  0xc0   : > { %980 = vmatpush3.bf16.msra.mxu1 %v1078_v41 }
 0x170   : > { %v466_v21 = vpop.f32.mrf.mxu0 }
 0x171   : > { %v467_v22 = vadd.f32 %v466_v21, %v421_v19  ;;  %v1084_v19 = vld [vmem:[%s1487_s5] sm:$0xff]  }
 0x172   : > { %v468_v23 = vpop.f32.mrf.mxu0 }
 0x173   : > { %v1345_v24 = vadd.f32 %v468_v23, %v425_v20  ;;  %v474_v25 = vsel %vm473_vm3, %v467_v22, -inf }
 0x174   : > { %v470_v26 = vpop.f32.mrf.mxu0  ;;  %475 = vmax.xlane.f32.xlu0 %v474_v25 }
 0x175   : > { %715 = vrot.lane.b32.xlu1 %v1345_v24, %s1178_s14 }
 0x176   : > { %v471_v27 = vpop.f32.mrf.mxu0 }
 0x179   : > { %725 = vrot.lane.b32.xlu1 %v1345_v24, %s1179_s26 }
 0x1e7   : > { %v716_v2 = vpop.permute.xlu1 %715 }
 0x1eb   : > { %v726_v11 = vpop.permute.xlu1 %725 }
 0x1fd   : > { %v476_v33 = vpop.xlane.xlu0 %475 }
 0x1fe   : > { %v477_v34 = vsub.f32 %v467_v22, %v476_v33 }
 0x200   : > { %v478_v35 = vmul.f32 1.442695, %v477_v34 }
 0x202   : > { %1085 = vpow2.f32 %v478_v35 }
 0x20f   : > { %v1086_v36 = vpop.eup %1085 }
 0x210   : > { %v480_v37 = vsel %vm473_vm3, %v1086_v36, 0.0 }
 0x211   : > { %481 = vadd.xlane.f32.xlu0 %v480_v37 }
 0x29a   : > { %v482_v44 = vpop.xlane.xlu0 %481 }
 0x29b   : > { %1087 = vrcp.f32 %v482_v44 }
 0x2a8   : > { %v1088_v45 = vpop.eup %1087 }
 0x2a9   : > { %v484_v47 = vmul.f32 %v1088_v45, %v1086_v36 }
 0x2ab   : > { %v485_v48 = vpack.c.bf16 %v484_v47, %v484_v47  ;;  %827 = vst.msk [vmem:[%s1299_s16 + $0x1] sm:$0x1] %vm1398_vm5, %v484_v47 }
 0x2ad   : > { %982 = vmatmul.mubr.bf16.vlgmr.msra.gmra.mxu1 %v485_v48 }
 0x36d   : > { %v584_v49 = vpop.f32.mrf.mxu1 }
 0x36e   : > { %v590_v51 = vpack.c.bf16 %v584_v49, %v584_v49 }
 0x36f   : > { %v983_v52 = vpop.f32.mrf.mxu1 }
 0x370   : > { %990 = vmatmul.mubr.msk.bf16.vlgmr.msra.gmra.mxu0 %vm607_vm6, %v590_v51 }
 0x371   : > { %v587_v53 = vpop.f32.mrf.mxu1  ;;  %994 = vmatpush3.bf16.msra.mxu0 %v1081_v50  ;;  %997 = vmatprep.mubr.msk.bf16.mxu0 %vm1181_vm4, %v1180_v29 }
 0x372   : > { %995 = vmatprep.subr.bf16.mxu0 %v1180_v29 }
 0x373   : > { %v984_v54 = vpop.f32.mrf.mxu1 }
 0x375   : > { %996 = vmatpush3.bf16.msra.mxu0 %v1082_v55 }
 0x376   : > { %1001 = vmatprep.subr.bf16.mxu0 %v1180_v29 }
 0x430   : > { %v645_v56 = vpop.f32.mrf.mxu0 }
 0x431   : > { %v651_v57 = vadd.f32 %v645_v56, %v1345_v24 }
 0x432   : > { %v991_v58 = vpop.f32.mrf.mxu0 }
 0x433   : > { %v652_v59 = vmax.f32 %v651_v57, 0.0 }
 0x434   : > { %v648_v60 = vpop.f32.mrf.mxu0 }
 0x435   : > { %v653_v61 = vpack.c.bf16 %v652_v59, %v652_v59 }
 0x436   : > { %v992_v62 = vpop.f32.mrf.mxu0 }
 0x437   : > { %998 = vmatmul.mubr.msk.bf16.vlgmr.msra.gmra.mxu0 %vm607_vm6, %v653_v61 }
 0x438   : > { %1005 = vmatprep.mubr.msk.bf16.mxu0 %vm1181_vm4, %v1180_v29  ;;  %1002 = vmatpush3.bf16.msra.mxu0 %v1083_v18 }
 0x439   : > { %1003 = vmatprep.subr.bf16.mxu0 %v1180_v29 }
 0x43c   : > { %1004 = vmatpush3.bf16.msra.mxu0 %v1084_v19 }
 0x4f7   : > { %v708_v0 = vpop.f32.mrf.mxu0 }
 0x4f8   : > { %v709_v1 = vadd.f32 %v708_v0, %v658_v63 }
 0x4f9   : > { %v999_v3 = vpop.f32.mrf.mxu0 }
 0x4fa   : > { %v718_v4 = vadd.f32 %v716_v2, %v709_v1 }
 0x4fb   : > { %v711_v5 = vpop.f32.mrf.mxu0 }
 0x4fc   : > { %v940_v6 = vmul.f32 -1.442695, %v718_v4 }
 0x4fd   : > { %v1000_v7 = vpop.f32.mrf.mxu0 }
 0x4fe   : > { %1089 = vpow2.f32 %v940_v6 }
 0x50b   : > { %v1090_v8 = vpop.eup %1089 }
 0x50c   : > { %v722_v9 = vadd.f32 1.0, %v1090_v8 }
 0x50e   : > { %1091 = vrcp.f32 %v722_v9 }
 0x51b   : > { %v1092_v10 = vpop.eup %1091 }
 0x51c   : > { %v728_v13 = vmul.f32 %v1092_v10, %v726_v11  ;;  %v735_v21 = vsub.f32 1.0, %v1092_v10  ;;  %v741_v23 = vmul.f32 %v1092_v10, %v1333_v12  ;;  %v1183_v12 = vmov 1966171168  }
 0x51d   : > { %v830_v33 = vunpack.c.l.s4 %v1183_v12 }
 0x51e   : > { %730 = vrot.lane.b32.xlu0 %v728_v13, %s1182_s15  ;;  %s1502_s15 = sand.u32 1, %s1165_s23  }
 0x51f   : > { %v831_v36 = vunpack.c.0.s8 %v830_v33  ;;  %s850_s17 = scalar_lea.sflag [#allocation6], %s1502_s15 }
 0x521   : > { %v834_v37 = vsub.s32 %v831_v36, %v1338_v15 }
 0x590   : > { %v731_v16 = vpop.permute.xlu0 %730 }
 0x591   : > { %v733_v17 = vadd.f32 %v731_v16, %v709_v1 }
 0x593   : > { %1093 = vtanh.f32 %v733_v17 }
 0x5a0   : > { %v1094_v20 = vpop.eup %1093 }
 0x5a1   : > { %737 = vrot.lane.b32.xlu1 %v1094_v20, %s1178_s14 }
 0x613   : > { %v738_v22 = vpop.permute.xlu1 %737 }
 0x614   : > { %v740_v24 = vmul.f32 %v738_v22, %v735_v21 }
 0x616   : > { %v742_v25 = vadd.f32 %v741_v23, %v740_v24 }
 0x618   : > { %821 = vst.msk [vmem:[#allocation2] sm:$0x1] %vm820_vm7, %v742_v25  ;;  %v743_v26 = vpack.c.bf16 %v742_v25, %v742_v25  ;;  %v835_v38 = vrot.slane %v742_v25, %v834_v37 }
 0x61a   : > { %750 = vrot.lane.b32.xlu1 %v743_v26, %s1178_s14  ;;  %v842_v39 = vrot.slane %v835_v38, %v834_v37 }
 0x68c   : > { %v751_v27 = vpop.permute.xlu1 %750 }
 0x68d   : > { %1006 = vmatmul.mubr.msk.bf16.vlgmr.msra.gmra.mxu0 %vm607_vm6, %v751_v27 }
 0x74d   : > { %v801_v29 = vpop.f32.mrf.mxu0 }
 0x74e   : > { %v802_v30 = vadd.f32 %v801_v29, %v748_v28 }
 0x74f   : > { %v1007_v31 = vpop.f32.mrf.mxu0 }
 0x750   : > { %v807_v32 = vsel %vm473_vm3, %v802_v30, -inf }
 0x751   : > { %808 = vmax.xlane.f32.xlu1 %v807_v32  ;;  %v804_v34 = vpop.f32.mrf.mxu0 }
 0x753   : > { %v1008_v35 = vpop.f32.mrf.mxu0 }
 0x762   : > { %843 = vrot.lane.b32.xlu1 %v842_v39, %s1178_s14  ;;  %s1010_s14 = smul.u32 48, %s1269_s25  ;;  %s1115_s25 = sshll.u32 %s1184_s19, 4  ;;  %s1116_s25 = int_to_ptr.vmem [resolvable:$false] %s1115_s25 }
 0x763   : > { %s1117_s10 = scalar_lea.vmem %s1116_s25, 96  ;;  %p1118_p5 = scmp.lt.s32.totalorder %s865_s20, %s1116_s25 }
 0x764   : > { %s862_s29 = scalar_lea.hbm %s1493_s11, %s1010_s14  ;;  %p1119_p6 = scmp.lt.s32.totalorder %s1117_s10, %s1111_s18 }
 0x766   : > { %p1120_p7 = por %p1119_p6, %p1118_p5 }
 0x768   : > { %p1121_p8 = pnand %p1120_p7, %p1114_p4 }
 0x7da   : > { %v809_v40 = vpop.xlane.xlu1 %808 }
 0x7db   : > { %v810_v41 = vsub.f32 %v802_v30, %v809_v40 }
 0x7dd   : > { %v811_v42 = vmul.f32 1.442695, %v810_v41 }
 0x7de   : > { %v844_v43 = vpop.permute.xlu1 %843 }
 0x7df   : > { %1095 = vpow2.f32 %v811_v42  ;;  %848 = vst.msk [vmem:[%s1299_s16 + $0x2] sm:$0x1] %vm846_vm8, %v844_v43 }
 0x7ec   : > { %v1096_v44 = vpop.eup %1095 }
 0x7ed   : > { %v813_v45 = vsel %vm473_vm3, %v1096_v44, 0.0 }
 0x7ee   : > { %814 = vadd.xlane.f32.xlu0 %v813_v45 }
 0x877   : > { %v815_v15 = vpop.xlane.xlu0 %814 }
 0x878   : > { %1097 = vlog2.f32 %v815_v15 }
 0x885   : > { %v1098_v47 = vpop.eup %1097 }
 0x886   : > { %v817_v48 = vmul.f32 0.6931472, %v1098_v47 }
 0x888   : > { %v818_v49 = vadd.f32 %v817_v48, %v809_v40 }
 0x88a   : > { %v819_v50 = vsub.f32 %v802_v30, %v818_v49 }
 0x88c   : > { %826 = vst.msk [vmem:[%s1299_s16] sm:$0x1] %vm1398_vm5, %v819_v50 }
 0x88d   : > { %1124 = shalt.err (!%p1121_p8)
}
 0x88e   : > { %s1125_s30 = scalar_lea.hbm %s862_s29, 48  ;;  %s1129_s14 = scalar_lea.hbm %s1493_s11, 288 }
 0x88f   : > { %p1126_p9 = scmp.ne.s32.totalorder %s862_s29, %s1125_s30  ;;  %p1130_p0 = scmp.lt.s32.totalorder %s862_s29, %s1493_s11 }
 0x890   : > { %p1131_p1 = scmp.lt.s32.totalorder %s1129_s14, %s1125_s30 }
 0x891   : > { %p1127_p12 = pnand %p1126_p9, %p1286_p10 }
 0x892   : > { %p1132_p2 = por %p1131_p1, %p1130_p0 }
 0x893   : > { %p1128_p13 = pneg %p1127_p12 }
 0x895   : > { %p1133_p3 = pnand %p1132_p2, %p1128_p13 }
 0x897   : > { %1136 = shalt.err (!%p1133_p3)
}
 0x898   : > { %1011 = dma.vmem_to_hbm [thread:$0]  (%p1286_p10), %s865_s20, 48, %s862_s29, %s850_s17  }
 0x899 PF: > { %p1017_p4 = scmp.ge.s32.totalorder %s1173_s24, 2  ;;  %s876_s15 = sand.u32 1, %s1161_s22  }
 0x89a   : > { %s877_s18 = scalar_lea.sflag [#allocation6], %s876_s15 }
 0x89b   : > { %p1014_p5 = pnand %p1017_p4, %p1290_p11 }
 0x89d   : > { %p1015_p6 = pneg %p1014_p5 }
 0x89f   : > { %1156 = dma.done.wait (%p1015_p6), %s877_s18, 48  }
 0x8a0   : > { %1158 = vsyncadd (%p1015_p6), %s877_s18, 4294967248  ;;  %s1503_s19 = sld [smem:[#allocation9_spill]]  ;;  %p27_p7 = scmp.ge.s32.totalorder %s1273_s27, 8  }
 0x8a1   : > { %s1504_s22 = smov %s1165_s23  ;;  %s1505_s23 = smov %s1169_s0 }
 0x8a2   : > { %s1507_s24 = smov %s1273_s27  ;;  %29 = sbr.rel (!%p27_p7) target bundleno = 18 (0x12), region = 97 }
 0x8a6   : > { %s1506_s0 = smov %s1503_s19 }
 0x8a7   :  { %882 = vsyncpa [#allocation6], 1 }
 0x8a8   :  { %884 = vsyncpa [#allocation6 + $0x1], 1 }

</bundles_post_ra>
